<compile_context>
chip_gen: v5e
topology: v5e:2x2
jax: 0.10.0
libtpu: 0.0.40
codegen_flags: <defaults>
</compile_context>

<pallas_src>
import functools

import jax
import jax.numpy as jnp
from jax.experimental import pallas as pl
from jax.experimental.pallas import tpu as pltpu


# ----------------------------------------------------------------------------
# Primary path: zero-copy aliased view (no bytes moved).
# ----------------------------------------------------------------------------
def _alias_view_kernel(x_ref, o_ref):
    # Output aliases the input buffer; a contiguous .view is byte-identical,
    # so there is nothing to move.  touch() pins a (fake) dependency on the
    # aliased output so the call is not optimized away.
    del x_ref
    pltpu.touch(o_ref)


def _alias_view_call(x):
    return pl.pallas_call(
        _alias_view_kernel,
        out_shape=jax.ShapeDtypeStruct(x.shape, x.dtype),
        in_specs=[pl.BlockSpec(memory_space=pl.ANY)],
        out_specs=pl.BlockSpec(memory_space=pl.ANY),
        input_output_aliases={0: 0},
        compiler_params=pltpu.CompilerParams(has_side_effects=True),
    )(x)


# ----------------------------------------------------------------------------
# Fallback path: one HBM->HBM DMA (no VMEM staging, no grid).
# ----------------------------------------------------------------------------
def _dma_view_kernel(x_ref, o_ref, sem):
    cp = pltpu.make_async_copy(x_ref, o_ref, sem)
    cp.start()
    cp.wait()


def _dma_view_call(x):
    return pl.pallas_call(
        _dma_view_kernel,
        out_shape=jax.ShapeDtypeStruct(x.shape, x.dtype),
        in_specs=[pl.BlockSpec(memory_space=pl.ANY)],
        out_specs=pl.BlockSpec(memory_space=pl.ANY),
        scratch_shapes=[pltpu.SemaphoreType.DMA(())],
    )(x)


_ALIAS_PATH_OK = None  # cached result of the one-time lowering probe


def _alias_path_supported(shape, dtype):
    """One-time AOT probe: does the zero-copy (aliased, no-op) kernel lower?"""
    global _ALIAS_PATH_OK
    if _ALIAS_PATH_OK is None:
        try:
            jax.jit(_alias_view_call).lower(
                jax.ShapeDtypeStruct(shape, dtype)).compile()
            _ALIAS_PATH_OK = True
        except Exception:
            _ALIAS_PATH_OK = False
    return _ALIAS_PATH_OK


def view_merge_channels(x, n, h, w):
    """Equivalent of torch `x.view(n, -1, h, w)` on a contiguous tensor."""
    total = x.size
    assert total % (n * h * w) == 0, (x.shape, n, h, w)
    out_shape = (n, total // (n * h * w), h, w)

    # Metadata-only reshape to the module's output shape (free under jit).
    x_view = jnp.reshape(x, out_shape)

    if _alias_path_supported(x_view.shape, x_view.dtype):
        return _alias_view_call(x_view)
    # TODO(synk): alias path rejected by this toolchain; use one HBM->HBM DMA.
    return _dma_view_call(x_view)


if __name__ == "__main__":
    key = jax.random.PRNGKey(0)
    # Shapes implied by the module: x27 = [1, 24, 2, 28, 28],
    # x20 = 1, x22 = 28, x23 = 28  ->  output [1, 48, 28, 28].
    x27 = jax.random.normal(key, (1, 24, 2, 28, 28), dtype=jnp.float32)

    # Reference (same semantics as torch .view on a contiguous tensor).
    ref = jnp.reshape(x27, (1, -1, 28, 28))

    # Warm the lowering probe eagerly, then run the (jitted) forward pass once.
    _alias_path_supported((1, 48, 28, 28), jnp.float32)
    fwd = jax.jit(functools.partial(view_merge_channels, n=1, h=28, w=28))
    out = jax.block_until_ready(fwd(x27))

    assert out.shape == (1, 48, 28, 28), out.shape
    assert jnp.array_equal(out, ref), "mismatch vs reference reshape"

    print("KERNEL_OK")
</pallas_src>

<mosaic_0001>
module attributes {stable_mosaic.version = 11 : i64} {
  func.func @_dma_view_kernel(%arg0: memref<1x48x28x28xf32, #tpu.memory_space<any>>, %arg1: memref<1x48x28x28xf32, #tpu.memory_space<any>>, %arg2: memref<!tpu.dma_semaphore, #tpu.memory_space<semaphore_mem>>) attributes {dimension_semantics = [], scalar_prefetch = 0 : i64, scratch_operands = 1 : i64, tpu.core_type = #tpu.core_type<tc>} {
    tpu.enqueue_dma source(%arg0 : memref<1x48x28x28xf32, #tpu.memory_space<any>>) target(%arg1 : memref<1x48x28x28xf32, #tpu.memory_space<any>>) target_semaphore(%arg2 : memref<!tpu.dma_semaphore, #tpu.memory_space<semaphore_mem>>)
    tpu.wait_dma2 semaphore(%arg2 : memref<!tpu.dma_semaphore, #tpu.memory_space<semaphore_mem>>) src(%arg0 : memref<1x48x28x28xf32, #tpu.memory_space<any>>) dst(%arg1 : memref<1x48x28x28xf32, #tpu.memory_space<any>>)
    return
  }
}

</mosaic_0001>

<bundles_post_ra>
// kernel: view_merge_channels.1
= control target key start
LH: loop header
LB: loop body
LE: loop exit
PB: predicated region body
PF: predicated region fallthrough
CT: control target
= control target key end

     0   :  { %s1696_s0 = inlined_call_operand.vmem [shape: f32[1,48,28,28], index: 0, kind: input, shape index: {}]   ;;  %s1697_s1 = inlined_call_operand.vmem [shape: f32[1,48,28,28], index: 1, kind: output, shape index: {}]  }
   0x1   :  { %v18_v0 = vld [vmem:[%s1696_s0] sm:$0xff]  ;;  %v20_v1 = vld [vmem:[%s1696_s0 + $0x8] sm:$0xff]  ;;  %v22_v2 = vld [vmem:[%s1696_s0 + $0x10] sm:$0xff] }
   0x2   :  { %19 = vst [vmem:[%s1697_s1] sm:$0xff] %v18_v0  ;;  %v24_v3 = vld [vmem:[%s1696_s0 + $0x20] sm:$0xff]  ;;  %v26_v4 = vld [vmem:[%s1696_s0 + $0x28] sm:$0xff]  ;;  %v28_v5 = vld [vmem:[%s1696_s0 + $0x30] sm:$0xff] }
   0x3   :  { %21 = vst [vmem:[%s1697_s1 + $0x8] sm:$0xff] %v20_v1  ;;  %v30_v6 = vld [vmem:[%s1696_s0 + $0x40] sm:$0xff]  ;;  %v32_v7 = vld [vmem:[%s1696_s0 + $0x48] sm:$0xff]  ;;  %v34_v8 = vld [vmem:[%s1696_s0 + $0x50] sm:$0xff] }
   0x4   :  { %23 = vst [vmem:[%s1697_s1 + $0x10] sm:$0xff] %v22_v2  ;;  %v36_v9 = vld [vmem:[%s1696_s0 + $0x60] sm:$0xff]  ;;  %v38_v10 = vld [vmem:[%s1696_s0 + $0x68] sm:$0xff]  ;;  %v40_v11 = vld [vmem:[%s1696_s0 + $0x70] sm:$0xff] }
   0x5   :  { %25 = vst [vmem:[%s1697_s1 + $0x20] sm:$0xff] %v24_v3  ;;  %v42_v12 = vld [vmem:[%s1696_s0 + $0x80] sm:$0xff]  ;;  %v44_v13 = vld [vmem:[%s1696_s0 + $0x88] sm:$0xff]  ;;  %v46_v14 = vld [vmem:[%s1696_s0 + $0x90] sm:$0xff] }
   0x6   :  { %27 = vst [vmem:[%s1697_s1 + $0x28] sm:$0xff] %v26_v4  ;;  %v48_v15 = vld [vmem:[%s1696_s0 + $0xa0] sm:$0xff]  ;;  %v50_v16 = vld [vmem:[%s1696_s0 + $0xa8] sm:$0xff]  ;;  %v52_v17 = vld [vmem:[%s1696_s0 + $0xb0] sm:$0xff] }
   0x7   :  { %29 = vst [vmem:[%s1697_s1 + $0x30] sm:$0xff] %v28_v5  ;;  %v54_v18 = vld [vmem:[%s1696_s0 + $0xc0] sm:$0xff]  ;;  %v56_v19 = vld [vmem:[%s1696_s0 + $0xc8] sm:$0xff]  ;;  %v58_v20 = vld [vmem:[%s1696_s0 + $0xd0] sm:$0xff] }
   0x8   :  { %31 = vst [vmem:[%s1697_s1 + $0x40] sm:$0xff] %v30_v6  ;;  %v60_v21 = vld [vmem:[%s1696_s0 + $0xe0] sm:$0xff]  ;;  %v62_v22 = vld [vmem:[%s1696_s0 + $0xe8] sm:$0xff]  ;;  %v64_v23 = vld [vmem:[%s1696_s0 + $0xf0] sm:$0xff] }
   0x9   :  { %33 = vst [vmem:[%s1697_s1 + $0x48] sm:$0xff] %v32_v7  ;;  %v66_v24 = vld [vmem:[%s1696_s0 + $0x100] sm:$0xff]  ;;  %v68_v25 = vld [vmem:[%s1696_s0 + $0x108] sm:$0xff]  ;;  %v70_v26 = vld [vmem:[%s1696_s0 + $0x110] sm:$0xff] }
   0xa   :  { %35 = vst [vmem:[%s1697_s1 + $0x50] sm:$0xff] %v34_v8  ;;  %v72_v27 = vld [vmem:[%s1696_s0 + $0x120] sm:$0xff]  ;;  %v74_v28 = vld [vmem:[%s1696_s0 + $0x128] sm:$0xff]  ;;  %v76_v29 = vld [vmem:[%s1696_s0 + $0x130] sm:$0xff] }
   0xb   :  { %37 = vst [vmem:[%s1697_s1 + $0x60] sm:$0xff] %v36_v9  ;;  %v78_v30 = vld [vmem:[%s1696_s0 + $0x140] sm:$0xff]  ;;  %v80_v31 = vld [vmem:[%s1696_s0 + $0x148] sm:$0xff]  ;;  %v82_v32 = vld [vmem:[%s1696_s0 + $0x150] sm:$0xff] }
   0xc   :  { %39 = vst [vmem:[%s1697_s1 + $0x68] sm:$0xff] %v38_v10  ;;  %v84_v33 = vld [vmem:[%s1696_s0 + $0x160] sm:$0xff]  ;;  %v86_v34 = vld [vmem:[%s1696_s0 + $0x168] sm:$0xff]  ;;  %v88_v35 = vld [vmem:[%s1696_s0 + $0x170] sm:$0xff] }
   0xd   :  { %41 = vst [vmem:[%s1697_s1 + $0x70] sm:$0xff] %v40_v11  ;;  %v90_v36 = vld [vmem:[%s1696_s0 + $0x180] sm:$0xff]  ;;  %v92_v37 = vld [vmem:[%s1696_s0 + $0x188] sm:$0xff]  ;;  %v94_v38 = vld [vmem:[%s1696_s0 + $0x190] sm:$0xff] }
   0xe   :  { %43 = vst [vmem:[%s1697_s1 + $0x80] sm:$0xff] %v42_v12  ;;  %v96_v39 = vld [vmem:[%s1696_s0 + $0x1a0] sm:$0xff]  ;;  %v98_v40 = vld [vmem:[%s1696_s0 + $0x1a8] sm:$0xff]  ;;  %v100_v41 = vld [vmem:[%s1696_s0 + $0x1b0] sm:$0xff] }
   0xf   :  { %45 = vst [vmem:[%s1697_s1 + $0x88] sm:$0xff] %v44_v13  ;;  %v102_v42 = vld [vmem:[%s1696_s0 + $0x1c0] sm:$0xff]  ;;  %v104_v43 = vld [vmem:[%s1696_s0 + $0x1c8] sm:$0xff]  ;;  %v106_v44 = vld [vmem:[%s1696_s0 + $0x1d0] sm:$0xff] }
  0x10   :  { %47 = vst [vmem:[%s1697_s1 + $0x90] sm:$0xff] %v46_v14  ;;  %v108_v45 = vld [vmem:[%s1696_s0 + $0x1e0] sm:$0xff]  ;;  %v110_v46 = vld [vmem:[%s1696_s0 + $0x1e8] sm:$0xff]  ;;  %v112_v47 = vld [vmem:[%s1696_s0 + $0x1f0] sm:$0xff] }
  0x11   :  { %49 = vst [vmem:[%s1697_s1 + $0xa0] sm:$0xff] %v48_v15  ;;  %v114_v48 = vld [vmem:[%s1696_s0 + $0x200] sm:$0xff]  ;;  %v116_v49 = vld [vmem:[%s1696_s0 + $0x208] sm:$0xff]  ;;  %v118_v50 = vld [vmem:[%s1696_s0 + $0x210] sm:$0xff] }
  0x12   :  { %51 = vst [vmem:[%s1697_s1 + $0xa8] sm:$0xff] %v50_v16  ;;  %v120_v51 = vld [vmem:[%s1696_s0 + $0x220] sm:$0xff]  ;;  %v122_v52 = vld [vmem:[%s1696_s0 + $0x228] sm:$0xff]  ;;  %v124_v53 = vld [vmem:[%s1696_s0 + $0x230] sm:$0xff] }
  0x13   :  { %53 = vst [vmem:[%s1697_s1 + $0xb0] sm:$0xff] %v52_v17  ;;  %v126_v54 = vld [vmem:[%s1696_s0 + $0x240] sm:$0xff]  ;;  %v128_v55 = vld [vmem:[%s1696_s0 + $0x248] sm:$0xff]  ;;  %v130_v56 = vld [vmem:[%s1696_s0 + $0x250] sm:$0xff] }
  0x14   :  { %55 = vst [vmem:[%s1697_s1 + $0xc0] sm:$0xff] %v54_v18  ;;  %v132_v57 = vld [vmem:[%s1696_s0 + $0x260] sm:$0xff]  ;;  %v134_v58 = vld [vmem:[%s1696_s0 + $0x268] sm:$0xff]  ;;  %v136_v59 = vld [vmem:[%s1696_s0 + $0x270] sm:$0xff] }
  0x15   :  { %57 = vst [vmem:[%s1697_s1 + $0xc8] sm:$0xff] %v56_v19  ;;  %v138_v60 = vld [vmem:[%s1696_s0 + $0x280] sm:$0xff]  ;;  %v140_v61 = vld [vmem:[%s1696_s0 + $0x288] sm:$0xff]  ;;  %v142_v62 = vld [vmem:[%s1696_s0 + $0x290] sm:$0xff] }
  0x16   :  { %59 = vst [vmem:[%s1697_s1 + $0xd0] sm:$0xff] %v58_v20  ;;  %v144_v63 = vld [vmem:[%s1696_s0 + $0x2a0] sm:$0xff]  ;;  %v146_v0 = vld [vmem:[%s1696_s0 + $0x2a8] sm:$0xff]  ;;  %v148_v1 = vld [vmem:[%s1696_s0 + $0x2b0] sm:$0xff] }
  0x17   :  { %61 = vst [vmem:[%s1697_s1 + $0xe0] sm:$0xff] %v60_v21  ;;  %v150_v2 = vld [vmem:[%s1696_s0 + $0x2c0] sm:$0xff]  ;;  %v152_v3 = vld [vmem:[%s1696_s0 + $0x2c8] sm:$0xff]  ;;  %v154_v4 = vld [vmem:[%s1696_s0 + $0x2d0] sm:$0xff] }
  0x18   :  { %63 = vst [vmem:[%s1697_s1 + $0xe8] sm:$0xff] %v62_v22  ;;  %v156_v5 = vld [vmem:[%s1696_s0 + $0x2e0] sm:$0xff]  ;;  %v158_v6 = vld [vmem:[%s1696_s0 + $0x2e8] sm:$0xff]  ;;  %v160_v7 = vld [vmem:[%s1696_s0 + $0x2f0] sm:$0xff] }
  0x19   :  { %65 = vst [vmem:[%s1697_s1 + $0xf0] sm:$0xff] %v64_v23  ;;  %v162_v8 = vld [vmem:[%s1696_s0 + $0x300] sm:$0xff]  ;;  %v164_v9 = vld [vmem:[%s1696_s0 + $0x308] sm:$0xff]  ;;  %v166_v10 = vld [vmem:[%s1696_s0 + $0x310] sm:$0xff] }
  0x1a   :  { %67 = vst [vmem:[%s1697_s1 + $0x100] sm:$0xff] %v66_v24  ;;  %v168_v11 = vld [vmem:[%s1696_s0 + $0x320] sm:$0xff]  ;;  %v170_v12 = vld [vmem:[%s1696_s0 + $0x328] sm:$0xff]  ;;  %v172_v13 = vld [vmem:[%s1696_s0 + $0x330] sm:$0xff] }
  0x1b   :  { %69 = vst [vmem:[%s1697_s1 + $0x108] sm:$0xff] %v68_v25  ;;  %v174_v14 = vld [vmem:[%s1696_s0 + $0x340] sm:$0xff]  ;;  %v176_v15 = vld [vmem:[%s1696_s0 + $0x348] sm:$0xff]  ;;  %v178_v16 = vld [vmem:[%s1696_s0 + $0x350] sm:$0xff] }
  0x1c   :  { %71 = vst [vmem:[%s1697_s1 + $0x110] sm:$0xff] %v70_v26  ;;  %v180_v17 = vld [vmem:[%s1696_s0 + $0x360] sm:$0xff]  ;;  %v182_v18 = vld [vmem:[%s1696_s0 + $0x368] sm:$0xff]  ;;  %v184_v19 = vld [vmem:[%s1696_s0 + $0x370] sm:$0xff] }
  0x1d   :  { %73 = vst [vmem:[%s1697_s1 + $0x120] sm:$0xff] %v72_v27  ;;  %v186_v20 = vld [vmem:[%s1696_s0 + $0x380] sm:$0xff]  ;;  %v188_v21 = vld [vmem:[%s1696_s0 + $0x388] sm:$0xff]  ;;  %v190_v22 = vld [vmem:[%s1696_s0 + $0x390] sm:$0xff] }
  0x1e   :  { %75 = vst [vmem:[%s1697_s1 + $0x128] sm:$0xff] %v74_v28  ;;  %v192_v23 = vld [vmem:[%s1696_s0 + $0x3a0] sm:$0xff]  ;;  %v194_v24 = vld [vmem:[%s1696_s0 + $0x3a8] sm:$0xff]  ;;  %v196_v25 = vld [vmem:[%s1696_s0 + $0x3b0] sm:$0xff] }
  0x1f   :  { %77 = vst [vmem:[%s1697_s1 + $0x130] sm:$0xff] %v76_v29  ;;  %v198_v26 = vld [vmem:[%s1696_s0 + $0x3c0] sm:$0xff]  ;;  %v200_v27 = vld [vmem:[%s1696_s0 + $0x3c8] sm:$0xff]  ;;  %v202_v28 = vld [vmem:[%s1696_s0 + $0x3d0] sm:$0xff] }
  0x20   :  { %79 = vst [vmem:[%s1697_s1 + $0x140] sm:$0xff] %v78_v30  ;;  %v204_v29 = vld [vmem:[%s1696_s0 + $0x3e0] sm:$0xff]  ;;  %v206_v30 = vld [vmem:[%s1696_s0 + $0x3e8] sm:$0xff] }
  0x21   :  { %81 = vst [vmem:[%s1697_s1 + $0x148] sm:$0xff] %v80_v31  ;;  %v208_v31 = vld [vmem:[%s1696_s0 + $0x3f0] sm:$0xff] }
  0x22   :  { %83 = vst [vmem:[%s1697_s1 + $0x150] sm:$0xff] %v82_v32  ;;  %v210_v32 = vld [vmem:[%s1696_s0 + $0x400] sm:$0xff] }
  0x23   :  { %85 = vst [vmem:[%s1697_s1 + $0x160] sm:$0xff] %v84_v33  ;;  %v212_v33 = vld [vmem:[%s1696_s0 + $0x408] sm:$0xff] }
  0x24   :  { %87 = vst [vmem:[%s1697_s1 + $0x168] sm:$0xff] %v86_v34  ;;  %v214_v34 = vld [vmem:[%s1696_s0 + $0x410] sm:$0xff] }
  0x25   :  { %89 = vst [vmem:[%s1697_s1 + $0x170] sm:$0xff] %v88_v35  ;;  %v216_v35 = vld [vmem:[%s1696_s0 + $0x420] sm:$0xff] }
  0x26   :  { %91 = vst [vmem:[%s1697_s1 + $0x180] sm:$0xff] %v90_v36  ;;  %v218_v36 = vld [vmem:[%s1696_s0 + $0x428] sm:$0xff] }
  0x27   :  { %93 = vst [vmem:[%s1697_s1 + $0x188] sm:$0xff] %v92_v37  ;;  %v220_v37 = vld [vmem:[%s1696_s0 + $0x430] sm:$0xff] }
  0x28   :  { %95 = vst [vmem:[%s1697_s1 + $0x190] sm:$0xff] %v94_v38  ;;  %v222_v38 = vld [vmem:[%s1696_s0 + $0x440] sm:$0xff] }
  0x29   :  { %97 = vst [vmem:[%s1697_s1 + $0x1a0] sm:$0xff] %v96_v39  ;;  %v224_v39 = vld [vmem:[%s1696_s0 + $0x448] sm:$0xff] }
  0x2a   :  { %99 = vst [vmem:[%s1697_s1 + $0x1a8] sm:$0xff] %v98_v40  ;;  %v226_v40 = vld [vmem:[%s1696_s0 + $0x450] sm:$0xff] }
  0x2b   :  { %101 = vst [vmem:[%s1697_s1 + $0x1b0] sm:$0xff] %v100_v41  ;;  %v228_v41 = vld [vmem:[%s1696_s0 + $0x460] sm:$0xff] }
  0x2c   :  { %103 = vst [vmem:[%s1697_s1 + $0x1c0] sm:$0xff] %v102_v42  ;;  %v230_v42 = vld [vmem:[%s1696_s0 + $0x468] sm:$0xff] }
  0x2d   :  { %105 = vst [vmem:[%s1697_s1 + $0x1c8] sm:$0xff] %v104_v43  ;;  %v232_v43 = vld [vmem:[%s1696_s0 + $0x470] sm:$0xff] }
  0x2e   :  { %107 = vst [vmem:[%s1697_s1 + $0x1d0] sm:$0xff] %v106_v44  ;;  %v234_v44 = vld [vmem:[%s1696_s0 + $0x480] sm:$0xff] }
  0x2f   :  { %109 = vst [vmem:[%s1697_s1 + $0x1e0] sm:$0xff] %v108_v45  ;;  %v236_v45 = vld [vmem:[%s1696_s0 + $0x488] sm:$0xff] }
  0x30   :  { %111 = vst [vmem:[%s1697_s1 + $0x1e8] sm:$0xff] %v110_v46  ;;  %v238_v46 = vld [vmem:[%s1696_s0 + $0x490] sm:$0xff] }
  0x31   :  { %113 = vst [vmem:[%s1697_s1 + $0x1f0] sm:$0xff] %v112_v47  ;;  %v240_v47 = vld [vmem:[%s1696_s0 + $0x4a0] sm:$0xff] }
  0x32   :  { %115 = vst [vmem:[%s1697_s1 + $0x200] sm:$0xff] %v114_v48  ;;  %v242_v48 = vld [vmem:[%s1696_s0 + $0x4a8] sm:$0xff] }
  0x33   :  { %117 = vst [vmem:[%s1697_s1 + $0x208] sm:$0xff] %v116_v49  ;;  %v244_v49 = vld [vmem:[%s1696_s0 + $0x4b0] sm:$0xff] }
  0x34   :  { %119 = vst [vmem:[%s1697_s1 + $0x210] sm:$0xff] %v118_v50  ;;  %v246_v50 = vld [vmem:[%s1696_s0 + $0x4c0] sm:$0xff] }
  0x35   :  { %121 = vst [vmem:[%s1697_s1 + $0x220] sm:$0xff] %v120_v51  ;;  %v248_v51 = vld [vmem:[%s1696_s0 + $0x4c8] sm:$0xff] }
  0x36   :  { %123 = vst [vmem:[%s1697_s1 + $0x228] sm:$0xff] %v122_v52  ;;  %v250_v52 = vld [vmem:[%s1696_s0 + $0x4d0] sm:$0xff] }
  0x37   :  { %125 = vst [vmem:[%s1697_s1 + $0x230] sm:$0xff] %v124_v53  ;;  %v252_v53 = vld [vmem:[%s1696_s0 + $0x4e0] sm:$0xff] }
  0x38   :  { %127 = vst [vmem:[%s1697_s1 + $0x240] sm:$0xff] %v126_v54  ;;  %v254_v54 = vld [vmem:[%s1696_s0 + $0x4e8] sm:$0xff] }
  0x39   :  { %129 = vst [vmem:[%s1697_s1 + $0x248] sm:$0xff] %v128_v55  ;;  %v256_v55 = vld [vmem:[%s1696_s0 + $0x4f0] sm:$0xff] }
  0x3a   :  { %131 = vst [vmem:[%s1697_s1 + $0x250] sm:$0xff] %v130_v56  ;;  %v258_v56 = vld [vmem:[%s1696_s0 + $0x500] sm:$0xff] }
  0x3b   :  { %133 = vst [vmem:[%s1697_s1 + $0x260] sm:$0xff] %v132_v57  ;;  %v260_v57 = vld [vmem:[%s1696_s0 + $0x508] sm:$0xff] }
  0x3c   :  { %135 = vst [vmem:[%s1697_s1 + $0x268] sm:$0xff] %v134_v58  ;;  %v262_v58 = vld [vmem:[%s1696_s0 + $0x510] sm:$0xff] }
  0x3d   :  { %137 = vst [vmem:[%s1697_s1 + $0x270] sm:$0xff] %v136_v59  ;;  %v264_v59 = vld [vmem:[%s1696_s0 + $0x520] sm:$0xff] }
  0x3e   :  { %139 = vst [vmem:[%s1697_s1 + $0x280] sm:$0xff] %v138_v60  ;;  %v266_v60 = vld [vmem:[%s1696_s0 + $0x528] sm:$0xff] }
  0x3f   :  { %141 = vst [vmem:[%s1697_s1 + $0x288] sm:$0xff] %v140_v61  ;;  %v268_v61 = vld [vmem:[%s1696_s0 + $0x530] sm:$0xff] }
  0x40   :  { %143 = vst [vmem:[%s1697_s1 + $0x290] sm:$0xff] %v142_v62  ;;  %v270_v62 = vld [vmem:[%s1696_s0 + $0x540] sm:$0xff] }
  0x41   :  { %145 = vst [vmem:[%s1697_s1 + $0x2a0] sm:$0xff] %v144_v63  ;;  %v272_v63 = vld [vmem:[%s1696_s0 + $0x548] sm:$0xff] }
  0x42   :  { %147 = vst [vmem:[%s1697_s1 + $0x2a8] sm:$0xff] %v146_v0  ;;  %v274_v0 = vld [vmem:[%s1696_s0 + $0x550] sm:$0xff] }
  0x43   :  { %149 = vst [vmem:[%s1697_s1 + $0x2b0] sm:$0xff] %v148_v1  ;;  %v276_v1 = vld [vmem:[%s1696_s0 + $0x560] sm:$0xff] }
  0x44   :  { %151 = vst [vmem:[%s1697_s1 + $0x2c0] sm:$0xff] %v150_v2  ;;  %v278_v2 = vld [vmem:[%s1696_s0 + $0x568] sm:$0xff] }
  0x45   :  { %153 = vst [vmem:[%s1697_s1 + $0x2c8] sm:$0xff] %v152_v3  ;;  %v280_v3 = vld [vmem:[%s1696_s0 + $0x570] sm:$0xff] }
  0x46   :  { %155 = vst [vmem:[%s1697_s1 + $0x2d0] sm:$0xff] %v154_v4  ;;  %v282_v4 = vld [vmem:[%s1696_s0 + $0x580] sm:$0xff] }
  0x47   :  { %157 = vst [vmem:[%s1697_s1 + $0x2e0] sm:$0xff] %v156_v5  ;;  %v284_v5 = vld [vmem:[%s1696_s0 + $0x588] sm:$0xff] }
  0x48   :  { %159 = vst [vmem:[%s1697_s1 + $0x2e8] sm:$0xff] %v158_v6  ;;  %v286_v6 = vld [vmem:[%s1696_s0 + $0x590] sm:$0xff] }
  0x49   :  { %161 = vst [vmem:[%s1697_s1 + $0x2f0] sm:$0xff] %v160_v7  ;;  %v288_v7 = vld [vmem:[%s1696_s0 + $0x5a0] sm:$0xff] }
  0x4a   :  { %163 = vst [vmem:[%s1697_s1 + $0x300] sm:$0xff] %v162_v8  ;;  %v290_v8 = vld [vmem:[%s1696_s0 + $0x5a8] sm:$0xff] }
  0x4b   :  { %165 = vst [vmem:[%s1697_s1 + $0x308] sm:$0xff] %v164_v9  ;;  %v292_v9 = vld [vmem:[%s1696_s0 + $0x5b0] sm:$0xff] }
  0x4c   :  { %167 = vst [vmem:[%s1697_s1 + $0x310] sm:$0xff] %v166_v10  ;;  %v294_v10 = vld [vmem:[%s1696_s0 + $0x5c0] sm:$0xff] }
  0x4d   :  { %169 = vst [vmem:[%s1697_s1 + $0x320] sm:$0xff] %v168_v11  ;;  %v296_v11 = vld [vmem:[%s1696_s0 + $0x5c8] sm:$0xff] }
  0x4e   :  { %171 = vst [vmem:[%s1697_s1 + $0x328] sm:$0xff] %v170_v12  ;;  %v298_v12 = vld [vmem:[%s1696_s0 + $0x5d0] sm:$0xff] }
  0x4f   :  { %173 = vst [vmem:[%s1697_s1 + $0x330] sm:$0xff] %v172_v13  ;;  %v300_v13 = vld [vmem:[%s1696_s0 + $0x5e0] sm:$0xff] }
  0x50   :  { %175 = vst [vmem:[%s1697_s1 + $0x340] sm:$0xff] %v174_v14  ;;  %v302_v14 = vld [vmem:[%s1696_s0 + $0x5e8] sm:$0xff] }
  0x51   :  { %177 = vst [vmem:[%s1697_s1 + $0x348] sm:$0xff] %v176_v15  ;;  %v304_v15 = vld [vmem:[%s1696_s0 + $0x5f0] sm:$0xff] }
  0x52   :  { %179 = vst [vmem:[%s1697_s1 + $0x350] sm:$0xff] %v178_v16  ;;  %v435_v16 = vld [vmem:[%s1696_s0 + $0x18] sm:$0xf] }
  0x53   :  { %181 = vst [vmem:[%s1697_s1 + $0x360] sm:$0xff] %v180_v17  ;;  %v437_v17 = vld [vmem:[%s1696_s0 + $0x38] sm:$0xf] }
  0x54   :  { %183 = vst [vmem:[%s1697_s1 + $0x368] sm:$0xff] %v182_v18  ;;  %v439_v18 = vld [vmem:[%s1696_s0 + $0x58] sm:$0xf] }
  0x55   :  { %185 = vst [vmem:[%s1697_s1 + $0x370] sm:$0xff] %v184_v19  ;;  %v441_v19 = vld [vmem:[%s1696_s0 + $0x78] sm:$0xf] }
  0x56   :  { %187 = vst [vmem:[%s1697_s1 + $0x380] sm:$0xff] %v186_v20  ;;  %v443_v20 = vld [vmem:[%s1696_s0 + $0x98] sm:$0xf] }
  0x57   :  { %189 = vst [vmem:[%s1697_s1 + $0x388] sm:$0xff] %v188_v21  ;;  %v445_v21 = vld [vmem:[%s1696_s0 + $0xb8] sm:$0xf] }
  0x58   :  { %191 = vst [vmem:[%s1697_s1 + $0x390] sm:$0xff] %v190_v22  ;;  %v447_v22 = vld [vmem:[%s1696_s0 + $0xd8] sm:$0xf] }
  0x59   :  { %193 = vst [vmem:[%s1697_s1 + $0x3a0] sm:$0xff] %v192_v23  ;;  %v449_v23 = vld [vmem:[%s1696_s0 + $0xf8] sm:$0xf] }
  0x5a   :  { %195 = vst [vmem:[%s1697_s1 + $0x3a8] sm:$0xff] %v194_v24  ;;  %v451_v24 = vld [vmem:[%s1696_s0 + $0x118] sm:$0xf] }
  0x5b   :  { %197 = vst [vmem:[%s1697_s1 + $0x3b0] sm:$0xff] %v196_v25  ;;  %v453_v25 = vld [vmem:[%s1696_s0 + $0x138] sm:$0xf] }
  0x5c   :  { %199 = vst [vmem:[%s1697_s1 + $0x3c0] sm:$0xff] %v198_v26  ;;  %v455_v26 = vld [vmem:[%s1696_s0 + $0x158] sm:$0xf] }
  0x5d   :  { %201 = vst [vmem:[%s1697_s1 + $0x3c8] sm:$0xff] %v200_v27  ;;  %v457_v27 = vld [vmem:[%s1696_s0 + $0x178] sm:$0xf] }
  0x5e   :  { %203 = vst [vmem:[%s1697_s1 + $0x3d0] sm:$0xff] %v202_v28  ;;  %v459_v28 = vld [vmem:[%s1696_s0 + $0x198] sm:$0xf] }
  0x5f   :  { %205 = vst [vmem:[%s1697_s1 + $0x3e0] sm:$0xff] %v204_v29  ;;  %v461_v29 = vld [vmem:[%s1696_s0 + $0x1b8] sm:$0xf] }
  0x60   :  { %207 = vst [vmem:[%s1697_s1 + $0x3e8] sm:$0xff] %v206_v30  ;;  %v463_v30 = vld [vmem:[%s1696_s0 + $0x1d8] sm:$0xf] }
  0x61   :  { %209 = vst [vmem:[%s1697_s1 + $0x3f0] sm:$0xff] %v208_v31  ;;  %v465_v31 = vld [vmem:[%s1696_s0 + $0x1f8] sm:$0xf] }
  0x62   :  { %211 = vst [vmem:[%s1697_s1 + $0x400] sm:$0xff] %v210_v32  ;;  %v467_v32 = vld [vmem:[%s1696_s0 + $0x218] sm:$0xf] }
  0x63   :  { %213 = vst [vmem:[%s1697_s1 + $0x408] sm:$0xff] %v212_v33  ;;  %v469_v33 = vld [vmem:[%s1696_s0 + $0x238] sm:$0xf] }
  0x64   :  { %215 = vst [vmem:[%s1697_s1 + $0x410] sm:$0xff] %v214_v34  ;;  %v471_v34 = vld [vmem:[%s1696_s0 + $0x258] sm:$0xf] }
  0x65   :  { %217 = vst [vmem:[%s1697_s1 + $0x420] sm:$0xff] %v216_v35  ;;  %v473_v35 = vld [vmem:[%s1696_s0 + $0x278] sm:$0xf] }
  0x66   :  { %219 = vst [vmem:[%s1697_s1 + $0x428] sm:$0xff] %v218_v36  ;;  %v475_v36 = vld [vmem:[%s1696_s0 + $0x298] sm:$0xf] }
  0x67   :  { %221 = vst [vmem:[%s1697_s1 + $0x430] sm:$0xff] %v220_v37  ;;  %v477_v37 = vld [vmem:[%s1696_s0 + $0x2b8] sm:$0xf] }
  0x68   :  { %223 = vst [vmem:[%s1697_s1 + $0x440] sm:$0xff] %v222_v38  ;;  %v479_v38 = vld [vmem:[%s1696_s0 + $0x2d8] sm:$0xf] }
  0x69   :  { %225 = vst [vmem:[%s1697_s1 + $0x448] sm:$0xff] %v224_v39  ;;  %v481_v39 = vld [vmem:[%s1696_s0 + $0x2f8] sm:$0xf] }
  0x6a   :  { %227 = vst [vmem:[%s1697_s1 + $0x450] sm:$0xff] %v226_v40  ;;  %v483_v40 = vld [vmem:[%s1696_s0 + $0x318] sm:$0xf] }
  0x6b   :  { %229 = vst [vmem:[%s1697_s1 + $0x460] sm:$0xff] %v228_v41  ;;  %v485_v41 = vld [vmem:[%s1696_s0 + $0x338] sm:$0xf] }
  0x6c   :  { %231 = vst [vmem:[%s1697_s1 + $0x468] sm:$0xff] %v230_v42  ;;  %v487_v42 = vld [vmem:[%s1696_s0 + $0x358] sm:$0xf] }
  0x6d   :  { %233 = vst [vmem:[%s1697_s1 + $0x470] sm:$0xff] %v232_v43  ;;  %v489_v43 = vld [vmem:[%s1696_s0 + $0x378] sm:$0xf] }
  0x6e   :  { %235 = vst [vmem:[%s1697_s1 + $0x480] sm:$0xff] %v234_v44  ;;  %v491_v44 = vld [vmem:[%s1696_s0 + $0x398] sm:$0xf] }
  0x6f   :  { %237 = vst [vmem:[%s1697_s1 + $0x488] sm:$0xff] %v236_v45  ;;  %v493_v45 = vld [vmem:[%s1696_s0 + $0x3b8] sm:$0xf] }
  0x70   :  { %239 = vst [vmem:[%s1697_s1 + $0x490] sm:$0xff] %v238_v46  ;;  %v495_v46 = vld [vmem:[%s1696_s0 + $0x3d8] sm:$0xf] }
  0x71   :  { %241 = vst [vmem:[%s1697_s1 + $0x4a0] sm:$0xff] %v240_v47  ;;  %v497_v47 = vld [vmem:[%s1696_s0 + $0x3f8] sm:$0xf] }
  0x72   :  { %243 = vst [vmem:[%s1697_s1 + $0x4a8] sm:$0xff] %v242_v48  ;;  %v499_v48 = vld [vmem:[%s1696_s0 + $0x418] sm:$0xf] }
  0x73   :  { %245 = vst [vmem:[%s1697_s1 + $0x4b0] sm:$0xff] %v244_v49  ;;  %v501_v49 = vld [vmem:[%s1696_s0 + $0x438] sm:$0xf] }
  0x74   :  { %247 = vst [vmem:[%s1697_s1 + $0x4c0] sm:$0xff] %v246_v50  ;;  %v503_v50 = vld [vmem:[%s1696_s0 + $0x458] sm:$0xf] }
  0x75   :  { %249 = vst [vmem:[%s1697_s1 + $0x4c8] sm:$0xff] %v248_v51  ;;  %v505_v51 = vld [vmem:[%s1696_s0 + $0x478] sm:$0xf] }
  0x76   :  { %251 = vst [vmem:[%s1697_s1 + $0x4d0] sm:$0xff] %v250_v52  ;;  %v507_v52 = vld [vmem:[%s1696_s0 + $0x498] sm:$0xf] }
  0x77   :  { %253 = vst [vmem:[%s1697_s1 + $0x4e0] sm:$0xff] %v252_v53  ;;  %v509_v53 = vld [vmem:[%s1696_s0 + $0x4b8] sm:$0xf] }
  0x78   :  { %255 = vst [vmem:[%s1697_s1 + $0x4e8] sm:$0xff] %v254_v54  ;;  %v511_v54 = vld [vmem:[%s1696_s0 + $0x4d8] sm:$0xf] }
  0x79   :  { %257 = vst [vmem:[%s1697_s1 + $0x4f0] sm:$0xff] %v256_v55  ;;  %v513_v55 = vld [vmem:[%s1696_s0 + $0x4f8] sm:$0xf] }
  0x7a   :  { %259 = vst [vmem:[%s1697_s1 + $0x500] sm:$0xff] %v258_v56  ;;  %v515_v56 = vld [vmem:[%s1696_s0 + $0x518] sm:$0xf] }
  0x7b   :  { %261 = vst [vmem:[%s1697_s1 + $0x508] sm:$0xff] %v260_v57  ;;  %v517_v57 = vld [vmem:[%s1696_s0 + $0x538] sm:$0xf] }
  0x7c   :  { %263 = vst [vmem:[%s1697_s1 + $0x510] sm:$0xff] %v262_v58  ;;  %v519_v58 = vld [vmem:[%s1696_s0 + $0x558] sm:$0xf] }
  0x7d   :  { %265 = vst [vmem:[%s1697_s1 + $0x520] sm:$0xff] %v264_v59  ;;  %v521_v59 = vld [vmem:[%s1696_s0 + $0x578] sm:$0xf] }
  0x7e   :  { %267 = vst [vmem:[%s1697_s1 + $0x528] sm:$0xff] %v266_v60  ;;  %v523_v60 = vld [vmem:[%s1696_s0 + $0x598] sm:$0xf] }
  0x7f   :  { %269 = vst [vmem:[%s1697_s1 + $0x530] sm:$0xff] %v268_v61  ;;  %v525_v61 = vld [vmem:[%s1696_s0 + $0x5b8] sm:$0xf] }
  0x80   :  { %271 = vst [vmem:[%s1697_s1 + $0x540] sm:$0xff] %v270_v62  ;;  %v527_v62 = vld [vmem:[%s1696_s0 + $0x5d8] sm:$0xf] }
  0x81   :  { %273 = vst [vmem:[%s1697_s1 + $0x548] sm:$0xff] %v272_v63  ;;  %v529_v63 = vld [vmem:[%s1696_s0 + $0x5f8] sm:$0xf] }
  0x82   :  { %275 = vst [vmem:[%s1697_s1 + $0x550] sm:$0xff] %v274_v0 }
  0x83   :  { %277 = vst [vmem:[%s1697_s1 + $0x560] sm:$0xff] %v276_v1 }
  0x84   :  { %279 = vst [vmem:[%s1697_s1 + $0x568] sm:$0xff] %v278_v2 }
  0x85   :  { %281 = vst [vmem:[%s1697_s1 + $0x570] sm:$0xff] %v280_v3 }
  0x86   :  { %283 = vst [vmem:[%s1697_s1 + $0x580] sm:$0xff] %v282_v4 }
  0x87   :  { %285 = vst [vmem:[%s1697_s1 + $0x588] sm:$0xff] %v284_v5 }
  0x88   :  { %287 = vst [vmem:[%s1697_s1 + $0x590] sm:$0xff] %v286_v6 }
  0x89   :  { %289 = vst [vmem:[%s1697_s1 + $0x5a0] sm:$0xff] %v288_v7 }
  0x8a   :  { %291 = vst [vmem:[%s1697_s1 + $0x5a8] sm:$0xff] %v290_v8 }
  0x8b   :  { %293 = vst [vmem:[%s1697_s1 + $0x5b0] sm:$0xff] %v292_v9 }
  0x8c   :  { %295 = vst [vmem:[%s1697_s1 + $0x5c0] sm:$0xff] %v294_v10 }
  0x8d   :  { %297 = vst [vmem:[%s1697_s1 + $0x5c8] sm:$0xff] %v296_v11 }
  0x8e   :  { %299 = vst [vmem:[%s1697_s1 + $0x5d0] sm:$0xff] %v298_v12 }
  0x8f   :  { %301 = vst [vmem:[%s1697_s1 + $0x5e0] sm:$0xff] %v300_v13 }
  0x90   :  { %303 = vst [vmem:[%s1697_s1 + $0x5e8] sm:$0xff] %v302_v14 }
  0x91   :  { %305 = vst [vmem:[%s1697_s1 + $0x5f0] sm:$0xff] %v304_v15 }
  0x92   :  { %436 = vst [vmem:[%s1697_s1 + $0x18] sm:$0xf] %v435_v16 }
  0x93   :  { %438 = vst [vmem:[%s1697_s1 + $0x38] sm:$0xf] %v437_v17 }
  0x94   :  { %440 = vst [vmem:[%s1697_s1 + $0x58] sm:$0xf] %v439_v18 }
  0x95   :  { %442 = vst [vmem:[%s1697_s1 + $0x78] sm:$0xf] %v441_v19 }
  0x96   :  { %444 = vst [vmem:[%s1697_s1 + $0x98] sm:$0xf] %v443_v20 }
  0x97   :  { %446 = vst [vmem:[%s1697_s1 + $0xb8] sm:$0xf] %v445_v21 }
  0x98   :  { %448 = vst [vmem:[%s1697_s1 + $0xd8] sm:$0xf] %v447_v22 }
  0x99   :  { %450 = vst [vmem:[%s1697_s1 + $0xf8] sm:$0xf] %v449_v23 }
  0x9a   :  { %452 = vst [vmem:[%s1697_s1 + $0x118] sm:$0xf] %v451_v24 }
  0x9b   :  { %454 = vst [vmem:[%s1697_s1 + $0x138] sm:$0xf] %v453_v25 }
  0x9c   :  { %456 = vst [vmem:[%s1697_s1 + $0x158] sm:$0xf] %v455_v26 }
  0x9d   :  { %458 = vst [vmem:[%s1697_s1 + $0x178] sm:$0xf] %v457_v27 }
  0x9e   :  { %460 = vst [vmem:[%s1697_s1 + $0x198] sm:$0xf] %v459_v28 }
  0x9f   :  { %462 = vst [vmem:[%s1697_s1 + $0x1b8] sm:$0xf] %v461_v29 }
  0xa0   :  { %464 = vst [vmem:[%s1697_s1 + $0x1d8] sm:$0xf] %v463_v30 }
  0xa1   :  { %466 = vst [vmem:[%s1697_s1 + $0x1f8] sm:$0xf] %v465_v31 }
  0xa2   :  { %468 = vst [vmem:[%s1697_s1 + $0x218] sm:$0xf] %v467_v32 }
  0xa3   :  { %470 = vst [vmem:[%s1697_s1 + $0x238] sm:$0xf] %v469_v33 }
  0xa4   :  { %472 = vst [vmem:[%s1697_s1 + $0x258] sm:$0xf] %v471_v34 }
  0xa5   :  { %474 = vst [vmem:[%s1697_s1 + $0x278] sm:$0xf] %v473_v35 }
  0xa6   :  { %476 = vst [vmem:[%s1697_s1 + $0x298] sm:$0xf] %v475_v36 }
  0xa7   :  { %478 = vst [vmem:[%s1697_s1 + $0x2b8] sm:$0xf] %v477_v37 }
  0xa8   :  { %480 = vst [vmem:[%s1697_s1 + $0x2d8] sm:$0xf] %v479_v38 }
  0xa9   :  { %482 = vst [vmem:[%s1697_s1 + $0x2f8] sm:$0xf] %v481_v39 }
  0xaa   :  { %484 = vst [vmem:[%s1697_s1 + $0x318] sm:$0xf] %v483_v40 }
  0xab   :  { %486 = vst [vmem:[%s1697_s1 + $0x338] sm:$0xf] %v485_v41 }
  0xac   :  { %488 = vst [vmem:[%s1697_s1 + $0x358] sm:$0xf] %v487_v42 }
  0xad   :  { %490 = vst [vmem:[%s1697_s1 + $0x378] sm:$0xf] %v489_v43 }
  0xae   :  { %492 = vst [vmem:[%s1697_s1 + $0x398] sm:$0xf] %v491_v44 }
  0xaf   :  { %494 = vst [vmem:[%s1697_s1 + $0x3b8] sm:$0xf] %v493_v45 }
  0xb0   :  { %496 = vst [vmem:[%s1697_s1 + $0x3d8] sm:$0xf] %v495_v46 }
  0xb1   :  { %498 = vst [vmem:[%s1697_s1 + $0x3f8] sm:$0xf] %v497_v47 }
  0xb2   :  { %500 = vst [vmem:[%s1697_s1 + $0x418] sm:$0xf] %v499_v48 }
  0xb3   :  { %502 = vst [vmem:[%s1697_s1 + $0x438] sm:$0xf] %v501_v49 }
  0xb4   :  { %504 = vst [vmem:[%s1697_s1 + $0x458] sm:$0xf] %v503_v50 }
  0xb5   :  { %506 = vst [vmem:[%s1697_s1 + $0x478] sm:$0xf] %v505_v51 }
  0xb6   :  { %508 = vst [vmem:[%s1697_s1 + $0x498] sm:$0xf] %v507_v52 }
  0xb7   :  { %510 = vst [vmem:[%s1697_s1 + $0x4b8] sm:$0xf] %v509_v53 }
  0xb8   :  { %512 = vst [vmem:[%s1697_s1 + $0x4d8] sm:$0xf] %v511_v54 }
  0xb9   :  { %514 = vst [vmem:[%s1697_s1 + $0x4f8] sm:$0xf] %v513_v55 }
  0xba   :  { %516 = vst [vmem:[%s1697_s1 + $0x518] sm:$0xf] %v515_v56 }
  0xbb   :  { %518 = vst [vmem:[%s1697_s1 + $0x538] sm:$0xf] %v517_v57 }
  0xbc   :  { %520 = vst [vmem:[%s1697_s1 + $0x558] sm:$0xf] %v519_v58 }
  0xbd   :  { %522 = vst [vmem:[%s1697_s1 + $0x578] sm:$0xf] %v521_v59 }
  0xbe   :  { %524 = vst [vmem:[%s1697_s1 + $0x598] sm:$0xf] %v523_v60 }
  0xbf   :  { %526 = vst [vmem:[%s1697_s1 + $0x5b8] sm:$0xf] %v525_v61 }
  0xc0   :  { %528 = vst [vmem:[%s1697_s1 + $0x5d8] sm:$0xf] %v527_v62 }
  0xc1   :  { %530 = vst [vmem:[%s1697_s1 + $0x5f8] sm:$0xf] %v529_v63 }
  0xc2   :  { %415 = vsyncadd [#allocation2], 21504 }
  0xc3   :  { %532 = dma.done.wait [#allocation2], 21504 }
  0xc4   :  { %533 = vsyncadd [#allocation2], 4294945792 }
  0xc5   :  { %421 = vsyncmov [#allocation2] }
  0xc8   :  { %s422_s20 = vpop.sfrf %421 }
  0xc9   :  { %p531_p0 = scmp.ne.s32.totalorder %s422_s20, 0 }
  0xcb   :  { %426 = shalt.err (%p531_p0)  }

</bundles_post_ra>
